<compile_context>
chip_gen: v6e
topology: v6e:2x2x1
jax: 0.10.0
libtpu: 0.0.40
codegen_flags: <defaults>
</compile_context>

<pallas_src>
import functools

import jax
import jax.numpy as jnp
from jax.experimental import pallas as pl
from jax.experimental.pallas import tpu as pltpu


def _round_up(x, m):
    return (x + m - 1) // m * m


# --------------------------------------------------------------------------- #
# One-shot prototype prep: L2-normalize (per prototype) and fold in 1/T.
# Input is already transposed to [D_pad, CP_pad]; the kernel is tiled over
# prototype columns so it works for arbitrarily large C*P.
# --------------------------------------------------------------------------- #
def _proto_prep_kernel(proto_t_ref, out_ref, *, inv_temperature):
    p = proto_t_ref[...].astype(jnp.float32)                       # [Dp, TR]
    # torch F.normalize guard max(||p||, 1e-12) expressed as rsqrt(max(ss, 1e-24)).
    inv_norm = jax.lax.rsqrt(
        jnp.maximum(jnp.sum(p * p, axis=0, keepdims=True), jnp.float32(1e-24)))
    out_ref[...] = (p * (inv_norm * jnp.float32(inv_temperature))).astype(out_ref.dtype)


# --------------------------------------------------------------------------- #
# Main per-batch-tile kernel.
# --------------------------------------------------------------------------- #
def _supcon_tile_kernel(feat_ref, proto_ref, labels_ref, col_class_ref, *rest,
                        inv_num_prototypes, batch_size, tile_b, rows_padded,
                        cols_padded, loss_scale, matmul_dtype):
    if cols_padded:
        col_bias_ref, out_ref = rest
    else:
        (out_ref,) = rest

    i = pl.program_id(0)

    # ---- L2-normalize the feature tile in f32.  1/temperature is folded into
    #      the prototypes, so the similarity matrix needs no extra scaling.
    f = feat_ref[...].astype(jnp.float32)                               # [TB, Dp]
    inv_norm = jax.lax.rsqrt(
        jnp.maximum(jnp.sum(f * f, axis=1, keepdims=True), jnp.float32(1e-24)))
    f_n = (f * inv_norm).astype(matmul_dtype)

    # ---- MXU: canonical [M,K] x [K,N] feed, f32 accumulation.
    sim = jax.lax.dot_general(
        f_n, proto_ref[...],
        dimension_numbers=(((1,), (0,)), ((), ())),
        preferred_element_type=jnp.float32)                             # [TB, CPp]

    if cols_padded:
        # -1e30 bias on padded prototype columns (precomputed, broadcast add).
        sim = sim + col_bias_ref[...]

    # Positive mask: padded columns carry class id == num_classes, so they never
    # match a real label (or the -1 padding label).
    pos = col_class_ref[...] == labels_ref[...]                         # [TB, CPp]

    # ---- every valid row has exactly P positives:
    #        loss_i = -scale * (sum_pos(sim_i)/P - max_i - logsumexp_i)
    m = jnp.max(sim, axis=1, keepdims=True)                             # [TB, 1]
    lse = jnp.log(jnp.sum(jnp.exp(sim - m), axis=1, keepdims=True))     # [TB, 1]
    pos_sum = jnp.sum(jnp.where(pos, sim, jnp.float32(0.0)),
                      axis=1, keepdims=True)                            # [TB, 1]

    per_sample = jnp.float32(-loss_scale) * (
        pos_sum * jnp.float32(inv_num_prototypes) - m - lse)            # [TB, 1]

    if rows_padded:
        row_ids = i * tile_b + jax.lax.broadcasted_iota(jnp.int32, (tile_b, 1), 0)
        per_sample = jnp.where(row_ids < batch_size, per_sample, jnp.float32(0.0))

    # Per-tile partial sum written as one lane-dense (8,128) block.
    tile_sum = jnp.sum(per_sample, axis=0, keepdims=True)               # [1, 1]
    out_ref[...] = jnp.broadcast_to(tile_sum, (8, 128))


# --------------------------------------------------------------------------- #
# Tile-size / VMEM budgeting (generation-aware).
# --------------------------------------------------------------------------- #
def _choose_tile_b(batch, d_pad, cp_pad, proto_bytes, feat_bytes):
    try:
        vmem_cap = int(pltpu.get_tpu_info().vmem_capacity_bytes)
    except Exception:            # interpret mode / older jax: assume smallest (v7x) VMEM
        vmem_cap = 64 * 1024 * 1024
    budget = int(vmem_cap * 0.65)

    resident = cp_pad * d_pad * proto_bytes        # prototypes (single-buffered)
    per_row = (2 * d_pad * feat_bytes              # feature tile (double-buffered)
               + 3 * cp_pad * 4                    # sim + exp/select f32 temporaries
               + 4 * 128)                          # labels / per-row scalars
    avail = max(budget - resident - (2 << 20), 8 * per_row)
    tb = int(avail // per_row)

    b_ceil = _round_up(batch, 8)
    tb = max(8, min(tb, 2048, b_ceil))
    if tb >= 256:
        tb = tb // 256 * 256     # MXU-native M granularity (also a 128-multiple for v5e)
    else:
        tb = max(8, tb // 8 * 8)
    if b_ceil > 256:
        # Keep at least two grid steps so both TensorCores get work on v7x.
        half = _round_up((b_ceil + 1) // 2, 256)
        tb = min(tb, max(256, half))
    return tb, resident, per_row, vmem_cap


# --------------------------------------------------------------------------- #
# Wrapper
# --------------------------------------------------------------------------- #
def supcon_loss_multi_proto(features, multi_prototypes, labels,
                            temperature=0.07, base_temperature=0.07,
                            matmul_dtype=jnp.bfloat16):
    """features: [B, D], multi_prototypes: [C, P, D], labels: [B] int."""
    batch, d = features.shape
    c, p, d2 = multi_prototypes.shape
    assert d2 == d
    cp = c * p

    d_pad = _round_up(d, 128)
    cp_pad = _round_up(cp, 128)
    proto_bytes = jnp.dtype(matmul_dtype).itemsize
    tile_b, resident, per_row, vmem_cap = _choose_tile_b(
        batch, d_pad, cp_pad, proto_bytes, proto_bytes)

    if resident + 8 * per_row > int(vmem_cap * 0.9):
        # TODO(synk): flash-style LSE over prototype chunks for very large C*P*D.
        raise ValueError(
            f"prototype matrix ({resident} bytes) does not fit in VMEM "
            f"({vmem_cap} bytes); chunked log-sum-exp fallback not implemented")

    b_pad = _round_up(batch, tile_b)
    num_tiles = b_pad // tile_b
    rows_padded = (b_pad != batch)
    cols_padded = (cp_pad != cp)

    # Zero-padding to lane-aligned shapes does not change norms or dot products;
    # padded prototype columns are masked, padded batch rows are zeroed in-kernel.
    feats = jnp.pad(features, ((0, b_pad - batch), (0, d_pad - d))).astype(matmul_dtype)
    labels_p = jnp.pad(labels.astype(jnp.int32), (0, b_pad - batch),
                       constant_values=-1).reshape(b_pad, 1)
    protos_t = jnp.pad(multi_prototypes.reshape(cp, d),
                       ((0, cp_pad - cp), (0, d_pad - d))).T          # one-shot XLA transpose

    # -- prototype prep kernel (runs once; column-tiled, size independent) ------
    prep_tr = 128
    prep_vmem = int(min(max(6 * d_pad * prep_tr * 4 + (2 << 20), 16 << 20),
                        int(vmem_cap * 0.9)))
    protos_prepped = pl.pallas_call(
        functools.partial(_proto_prep_kernel,
                          inv_temperature=1.0 / float(temperature)),
        out_shape=jax.ShapeDtypeStruct((d_pad, cp_pad), matmul_dtype),
        grid=(cp_pad // prep_tr,),
        in_specs=[pl.BlockSpec((d_pad, prep_tr), lambda i: (0, i))],
        out_specs=pl.BlockSpec((d_pad, prep_tr), lambda i: (0, i)),
        compiler_params=pltpu.CompilerParams(
            dimension_semantics=("arbitrary",), vmem_limit_bytes=prep_vmem),
    )(protos_t)

    # -- hoisted per-step constants ---------------------------------------------
    col_ids = jnp.arange(cp_pad, dtype=jnp.int32)
    # Padded columns get class id == c, which never matches any real label
    # (valid labels are in [0, c)) nor the -1 padding label.
    col_class = jnp.where(col_ids < cp, col_ids // p, jnp.int32(c)).reshape(1, cp_pad)

    inputs = [feats, protos_prepped, labels_p, col_class]
    in_specs = [
        pl.BlockSpec((tile_b, d_pad), lambda i: (i, 0)),       # features tile
        None,                                                   # prototypes (set below)
        pl.BlockSpec((tile_b, 1), lambda i: (i, 0)),            # labels tile
        pl.BlockSpec((1, cp_pad), lambda i: (0, 0)),            # column->class map
    ]
    if cols_padded:
        col_bias = jnp.where(col_ids < cp, 0.0, -1e30).astype(jnp.float32)
        inputs.append(col_bias.reshape(1, cp_pad))
        in_specs.append(pl.BlockSpec((1, cp_pad), lambda i: (0, 0)))

    kernel = functools.partial(
        _supcon_tile_kernel,
        inv_num_prototypes=1.0 / float(p),
        batch_size=batch,
        tile_b=tile_b,
        rows_padded=rows_padded,
        cols_padded=cols_padded,
        loss_scale=float(temperature) / float(base_temperature),
        matmul_dtype=matmul_dtype,
    )

    vmem_limit = int(min(max(2 * resident + 2 * tile_b * per_row + (4 << 20), 16 << 20),
                         int(vmem_cap * 0.9)))

    def _run(single_buffer_protos):
        if single_buffer_protos:
            proto_spec = pl.BlockSpec((d_pad, cp_pad), lambda i: (0, 0),
                                      pipeline_mode=pl.Buffered(1))
        else:
            proto_spec = pl.BlockSpec((d_pad, cp_pad), lambda i: (0, 0))
        specs = list(in_specs)
        specs[1] = proto_spec
        return pl.pallas_call(
            kernel,
            out_shape=jax.ShapeDtypeStruct((num_tiles * 8, 128), jnp.float32),
            grid=(num_tiles,),
            in_specs=specs,
            out_specs=pl.BlockSpec((8, 128), lambda i: (i, 0)),
            compiler_params=pltpu.CompilerParams(
                dimension_semantics=("parallel",),
                vmem_limit_bytes=vmem_limit),
        )(*inputs)

    try:
        partials = _run(True)          # single-buffered resident prototypes
    except Exception:                  # pipeline_mode unsupported -> default pipeline
        partials = _run(False)

    # Each (8,128) output block is filled with its tile's partial sum.
    return jnp.sum(partials[::8, 0]) / jnp.float32(batch)


# --------------------------------------------------------------------------- #
# Pure-JAX reference mirroring the PyTorch module (f32), for sanity checking.
# --------------------------------------------------------------------------- #
def _reference(features, multi_prototypes, labels, temperature=0.07,
               base_temperature=0.07):
    c, p, d = multi_prototypes.shape
    f = features / jnp.maximum(jnp.linalg.norm(features, axis=1, keepdims=True), 1e-12)
    pr = multi_prototypes / jnp.maximum(
        jnp.linalg.norm(multi_prototypes, axis=2, keepdims=True), 1e-12)
    flat = pr.reshape(c * p, d)
    sim = jnp.matmul(f, flat.T, precision=jax.lax.Precision.HIGHEST) / temperature
    col_class = jnp.arange(c * p) // p
    mask = (col_class[None, :] == labels[:, None]).astype(jnp.float32)
    logits = sim - jnp.max(sim, axis=1, keepdims=True)
    log_prob = logits - jnp.log(jnp.sum(jnp.exp(logits), axis=1, keepdims=True))
    plp = jnp.sum(mask * log_prob, axis=1) / jnp.sum(mask, axis=1)
    return jnp.mean(-(temperature / base_temperature) * plp)


if __name__ == "__main__":
    B, D = 8, 32          # batch_size, feature_dim
    C, P = 4, 2           # num_classes, num_prototypes

    key = jax.random.PRNGKey(0)
    kf, kp, kl = jax.random.split(key, 3)
    features = jax.random.normal(kf, (B, D), dtype=jnp.float32)
    multi_prototypes = jax.random.normal(kp, (C, P, D), dtype=jnp.float32)
    labels = jax.random.randint(kl, (B,), 0, C, dtype=jnp.int32)

    ref = _reference(features, multi_prototypes, labels)

    # Default fast path: bf16 MXU inputs, f32 accumulation and softmax math.
    loss_bf16 = supcon_loss_multi_proto(features, multi_prototypes, labels)
    jax.block_until_ready(loss_bf16)
    assert jnp.allclose(loss_bf16, ref, atol=5e-2, rtol=5e-2), (loss_bf16, ref)

    # High-precision fallback: f32 MXU inputs.  Tolerance still covers backends
    # whose default f32 matmul rounds operands through bf16.
    loss_f32 = supcon_loss_multi_proto(features, multi_prototypes, labels,
                                       matmul_dtype=jnp.float32)
    jax.block_until_ready(loss_f32)
    assert jnp.allclose(loss_f32, ref, atol=2e-2, rtol=2e-2), (loss_f32, ref)

    print("KERNEL_OK")
</pallas_src>

<mosaic_0001>
module attributes {stable_mosaic.version = 11 : i64} {
  func.func @_proto_prep_kernel(%arg0: i32, %arg1: memref<128x128xf32, #tpu.memory_space<vmem>>, %arg2: memref<128x128xbf16, #tpu.memory_space<vmem>>) attributes {dimension_semantics = [#tpu.dimension_semantics<arbitrary>], iteration_bounds = array<i64: 1>, scalar_prefetch = 0 : i64, scratch_operands = 0 : i64, tpu.core_type = #tpu.core_type<tc>, window_params = [{transform_indices = @transform_0, window_bounds = array<i64: 128, 128>}, {transform_indices = @transform_1, window_bounds = array<i64: 128, 128>}]} {
    %c0 = arith.constant 0 : index
    %c0_0 = arith.constant 0 : index
    %0 = vector.load %arg1[%c0, %c0_0] : memref<128x128xf32, #tpu.memory_space<vmem>>, vector<128x128xf32>
    %1 = arith.mulf %0, %0 : vector<128x128xf32>
    %cst = arith.constant dense<0.000000e+00> : vector<128xf32>
    %2 = vector.multi_reduction <add>, %1, %cst [0] : vector<128x128xf32> to vector<128xf32>
    %3 = vector.shape_cast %2 : vector<128xf32> to vector<1x128xf32>
    %cst_1 = arith.constant 1.000000e-24 : f32
    %4 = vector.broadcast %cst_1 : f32 to vector<1x128xf32>
    %5 = arith.maximumf %3, %4 : vector<1x128xf32>
    %6 = math.rsqrt %5 : vector<1x128xf32>
    %cst_2 = arith.constant 14.2857141 : f32
    %7 = vector.broadcast %cst_2 : f32 to vector<1x128xf32>
    %8 = arith.mulf %6, %7 : vector<1x128xf32>
    %9 = vector.broadcast %8 : vector<1x128xf32> to vector<128x128xf32>
    %10 = arith.mulf %0, %9 : vector<128x128xf32>
    %11 = arith.truncf %10 : vector<128x128xf32> to vector<128x128xbf16>
    %c0_3 = arith.constant 0 : index
    %c0_4 = arith.constant 0 : index
    %12 = vector.load %arg2[%c0_3, %c0_4] : memref<128x128xbf16, #tpu.memory_space<vmem>>, vector<128x128xbf16>
    tpu.vector_store %arg2[%c0_3, %c0_4], %11 {strides = array<i32>} : memref<128x128xbf16, #tpu.memory_space<vmem>>, vector<128x128xbf16>,
    return
  }
  func.func @transform_0(%arg0: i32) -> (i32, i32) {
    %c0_i32 = arith.constant 0 : i32
    %c0_i32_0 = arith.constant 0 : i32
    return %c0_i32, %arg0 : i32, i32
  }
  func.func @transform_1(%arg0: i32) -> (i32, i32) {
    %c0_i32 = arith.constant 0 : i32
    %c0_i32_0 = arith.constant 0 : i32
    return %c0_i32, %arg0 : i32, i32
  }
}

</mosaic_0001>

<bundles_post_ra>
// kernel: tpu_custom_call.1
= control target key start
LH: loop header
LB: loop body
LE: loop exit
PB: predicated region body
PF: predicated region fallthrough
CT: control target
= control target key end

     0   :  { %6 = vsyncpa [#allocation3], 0  ;;  %s345_s0 = inlined_call_operand.hbm [shape: f32[128,128], index: 0, kind: input, shape index: {}]   ;;  %s346_s1 = inlined_call_operand.hbm [shape: bf16[128,128], index: 1, kind: output, shape index: {}]  }
   0x1   :  { %7 = vsyncpa [#allocation4], 0  ;;  %s323_s6 = smov [#allocation2]  }
   0x2   :  { %s13_s7 = sshll.u32 %s323_s6, 4  ;;  %s14_s7 = int_to_ptr.vmem [resolvable:$true] %s13_s7 }
   0x3   :  { %s287_s8 = scalar_lea.vmem %s14_s7, 2048  ;;  %p292_p1 = scmp.lt.s32.totalorder %s14_s7, %s14_s7 }
   0x4   :  { %p288_p0 = scmp.ne.s32.totalorder %s14_s7, %s287_s8  ;;  %p293_p2 = scmp.lt.s32.totalorder %s287_s8, %s287_s8 }
   0x6   :  { %p294_p3 = por %p293_p2, %p292_p1 }
   0x8   :  { %p295_p4 = pnand %p294_p3, %p288_p0 }
   0xa   :  { %298 = shalt.err (!%p295_p4)
}
   0xb   :  { %s324_s9 = smov 128   ;;  %s325_s10 = smov 8  }
   0xc   :  { %19 = dma.hbm_to_vmem [thread:$0]  %s345_s0, 2048, %s14_s7, [#allocation3], %s324_s9, %s324_s9, %s325_s10  }
   0xd   :  { %319 = dma.done.wait [#allocation3], 2048  }
   0xe   :  { %320 = vsyncadd [#allocation3], 4294965248  ;;  %v23_v0 = vld [vmem:[#allocation2] sm:$0xff]  ;;  %v24_v1 = vld [vmem:[#allocation2 + $0x8] sm:$0xff]  ;;  %s326_s0 = smov [#allocation5]  }
   0xf   :  { %v25_v2 = vld [vmem:[#allocation2 + $0x10] sm:$0xff]  ;;  %v26_v3 = vld [vmem:[#allocation2 + $0x18] sm:$0xff]  ;;  %v39_v4 = vmul.f32 %v23_v0, %v23_v0  ;;  %v40_v5 = vmul.f32 %v24_v1, %v24_v1  ;;  %v27_v7 = vld [vmem:[#allocation2 + $0x20] sm:$0xff]  ;;  %s180_s13 = sshll.u32 %s326_s0, 4  ;;  %s181_s13 = int_to_ptr.vmem [resolvable:$true] %s180_s13 }
  0x10   :  { %v41_v6 = vmul.f32 %v25_v2, %v25_v2  ;;  %v42_v8 = vmul.f32 %v26_v3, %v26_v3  ;;  %v28_v10 = vld [vmem:[#allocation2 + $0x28] sm:$0xff]  ;;  %v43_v11 = vmul.f32 %v27_v7, %v27_v7  ;;  %v29_v13 = vld [vmem:[#allocation2 + $0x30] sm:$0xff]  ;;  %v30_v16 = vld [vmem:[#allocation2 + $0x38] sm:$0xff]  ;;  %s299_s14 = scalar_lea.vmem %s181_s13, 1024  ;;  %p304_p6 = scmp.lt.s32.totalorder %s181_s13, %s181_s13 }
  0x11   :  { %v55_v9 = vadd.f32 %v40_v5, %v39_v4  ;;  %v44_v14 = vmul.f32 %v28_v10, %v28_v10  ;;  %v45_v17 = vmul.f32 %v29_v13, %v29_v13  ;;  %v31_v19 = vld [vmem:[#allocation2 + $0x40] sm:$0xff]  ;;  %v46_v20 = vmul.f32 %v30_v16, %v30_v16  ;;  %v32_v22 = vld [vmem:[#allocation2 + $0x48] sm:$0xff]  ;;  %v33_v25 = vld [vmem:[#allocation2 + $0x50] sm:$0xff]  ;;  %p300_p5 = scmp.ne.s32.totalorder %s181_s13, %s299_s14  ;;  %p305_p7 = scmp.lt.s32.totalorder %s299_s14, %s299_s14 }
  0x12   :  { %v47_v23 = vmul.f32 %v31_v19, %v31_v19  ;;  %v48_v26 = vmul.f32 %v32_v22, %v32_v22  ;;  %v34_v28 = vld [vmem:[#allocation2 + $0x58] sm:$0xff]  ;;  %v49_v29 = vmul.f32 %v33_v25, %v33_v25  ;;  %v35_v31 = vld [vmem:[#allocation2 + $0x60] sm:$0xff]  ;;  %v36_v34 = vld [vmem:[#allocation2 + $0x68] sm:$0xff] }
  0x13   :  { %v56_v12 = vadd.f32 %v55_v9, %v41_v6  ;;  %v50_v32 = vmul.f32 %v34_v28, %v34_v28  ;;  %v51_v35 = vmul.f32 %v35_v31, %v35_v31  ;;  %v37_v37 = vld [vmem:[#allocation2 + $0x70] sm:$0xff]  ;;  %v52_v38 = vmul.f32 %v36_v34, %v36_v34  ;;  %v38_v40 = vld [vmem:[#allocation2 + $0x78] sm:$0xff]  ;;  %p306_p8 = por %p305_p7, %p304_p6 }
  0x14   :  { %v53_v41 = vmul.f32 %v37_v37, %v37_v37  ;;  %v54_v43 = vmul.f32 %v38_v40, %v38_v40 }
  0x15   :  { %v57_v15 = vadd.f32 %v56_v12, %v42_v8  ;;  %p307_p9 = pnand %p306_p8, %p300_p5 }
  0x17   :  { %v58_v18 = vadd.f32 %v57_v15, %v43_v11 }
  0x19   :  { %v59_v21 = vadd.f32 %v58_v18, %v44_v14 }
  0x1b   :  { %v60_v24 = vadd.f32 %v59_v21, %v45_v17 }
  0x1d   :  { %v61_v27 = vadd.f32 %v60_v24, %v46_v20 }
  0x1f   :  { %v62_v30 = vadd.f32 %v61_v27, %v47_v23 }
  0x21   :  { %v63_v33 = vadd.f32 %v62_v30, %v48_v26 }
  0x23   :  { %v64_v36 = vadd.f32 %v63_v33, %v49_v29 }
  0x25   :  { %v65_v39 = vadd.f32 %v64_v36, %v50_v32 }
  0x27   :  { %v66_v42 = vadd.f32 %v65_v39, %v51_v35 }
  0x29   :  { %v67_v44 = vadd.f32 %v66_v42, %v52_v38 }
  0x2b   :  { %v68_v45 = vadd.f32 %v67_v44, %v53_v41 }
  0x2d   :  { %v69_v46 = vadd.f32 %v68_v45, %v54_v43 }
  0x2f   :  { %v70_v47 = vrot.slane %v69_v46, 4 }
  0x31   :  { %v71_v48 = vadd.f32 %v70_v47, %v69_v46 }
  0x33   :  { %v72_v49 = vrot.slane %v71_v48, 2 }
  0x35   :  { %v73_v50 = vadd.f32 %v72_v49, %v71_v48 }
  0x37   :  { %v74_v51 = vrot.slane %v73_v50, 1 }
  0x39   :  { %v75_v52 = vadd.f32 %v74_v51, %v73_v50 }
  0x3b   :  { %v76_v53 = vmax.f32 %v75_v52, 1e-24 }
  0x3d   :  { %277 = vrsqrt.f32 %v76_v53 }
  0x4a   :  { %v278_v54 = vpop.eup %277 }
  0x4b   :  { %v78_v55 = vmul.f32 14.285714, %v278_v54 }
  0x4d   :  { %v79_v56 = vmul.f32 %v78_v55, %v23_v0  ;;  %v80_v57 = vmul.f32 %v78_v55, %v24_v1  ;;  %v81_v58 = vmul.f32 %v78_v55, %v25_v2  ;;  %v82_v59 = vmul.f32 %v78_v55, %v26_v3 }
  0x4e   :  { %v83_v60 = vmul.f32 %v78_v55, %v27_v7  ;;  %v84_v61 = vmul.f32 %v78_v55, %v28_v10  ;;  %v85_v62 = vmul.f32 %v78_v55, %v29_v13  ;;  %v86_v63 = vmul.f32 %v78_v55, %v30_v16 }
  0x4f   :  { %v227_v4 = vpack.c.bf16 %v80_v57, %v79_v56  ;;  %v232_v5 = vpack.c.bf16 %v82_v59, %v81_v58  ;;  %v87_v6 = vmul.f32 %v78_v55, %v31_v19  ;;  %v88_v8 = vmul.f32 %v78_v55, %v32_v22 }
  0x50   :  { %v237_v9 = vpack.c.bf16 %v84_v61, %v83_v60  ;;  %v242_v11 = vpack.c.bf16 %v86_v63, %v85_v62  ;;  %v89_v12 = vmul.f32 %v78_v55, %v33_v25  ;;  %v90_v14 = vmul.f32 %v78_v55, %v34_v28 }
  0x51   :  { %228 = vst [vmem:[#allocation5] sm:$0xff] %v227_v4   ;;  %264 = vst [vmem:[#allocation5 + $0x8] sm:$0xff] %v232_v5   ;;  %v247_v15 = vpack.c.bf16 %v88_v8, %v87_v6  ;;  %v91_v17 = vmul.f32 %v78_v55, %v35_v31  ;;  %v92_v0 = vmul.f32 %v78_v55, %v36_v34 }
  0x52   :  { %v93_v1 = vmul.f32 %v78_v55, %v37_v37  ;;  %265 = vst [vmem:[#allocation5 + $0x10] sm:$0xff] %v237_v9   ;;  %266 = vst [vmem:[#allocation5 + $0x18] sm:$0xff] %v242_v11   ;;  %v252_v2 = vpack.c.bf16 %v90_v14, %v89_v12  ;;  %v94_v3 = vmul.f32 %v78_v55, %v38_v40 }
  0x53   :  { %267 = vst [vmem:[#allocation5 + $0x20] sm:$0xff] %v247_v15   ;;  %v257_v7 = vpack.c.bf16 %v92_v0, %v91_v17 }
  0x54   :  { %268 = vst [vmem:[#allocation5 + $0x28] sm:$0xff] %v252_v2   ;;  %v262_v10 = vpack.c.bf16 %v94_v3, %v93_v1 }
  0x55   :  { %269 = vst [vmem:[#allocation5 + $0x30] sm:$0xff] %v257_v7  }
  0x56   :  { %270 = vst [vmem:[#allocation5 + $0x38] sm:$0xff] %v262_v10  }
  0x57   :  { %310 = shalt.err (!%p307_p9)
}
  0x58   :  { %s327_s15 = smov 64   ;;  %s328_s16 = smov 4  }
  0x59   :  { %186 = dma.vmem_to_hbm [thread:$0]  %s181_s13, 1024, %s346_s1, [#allocation4], %s327_s15, %s327_s15, %s328_s16  }
  0x5a   :  { %321 = dma.done.wait [#allocation4], 1024  }
  0x5b   :  { %322 = vsyncadd [#allocation4], 4294966272 }
  0x5c   :  { %190 = vsyncpa [#allocation3], 1 }
  0x5d   :  { %191 = vsyncpa [#allocation4], 1 }

</bundles_post_ra>
